<compile_context>
chip_gen: v6e
topology: v6e:2x2x1
jax: 0.10.0
libtpu: 0.0.40
codegen_flags: <defaults>
</compile_context>

<pallas_src>
import functools

import jax
import jax.numpy as jnp
from jax import lax
from jax.experimental import pallas as pl
from jax.experimental.pallas import tpu as pltpu


# ---------------------------------------------------------------------------
# Fused MHSA kernel: one grid step == one batch element.
# ---------------------------------------------------------------------------
def _mhsa_kernel(x_ref, wqkv_ref, wmerge_ref, bmerge_ref, o_ref, *, heads, emb):
    """x_ref:      (1, S, K)   f32
       wqkv_ref:   (K, 3*H*K)  bf16  (1/sqrt(K) already folded into Q columns)
       wmerge_ref: (H*K, K)    bf16
       bmerge_ref: (1, K)      f32
       o_ref:      (1, S, K)   f32
    """
    hk = heads * emb
    x = x_ref[0].astype(jnp.bfloat16)                                  # (S, K)

    # Fused Q/K/V projection: single lane-dense (S, 3*H*K) MXU matmul.
    qkv = jnp.dot(x, wqkv_ref[...], preferred_element_type=jnp.float32)

    head_outs = []
    for h in range(heads):                                             # static unroll
        q_h = qkv[:, h * emb:(h + 1) * emb].astype(jnp.bfloat16)
        k_h = qkv[:, hk + h * emb:hk + (h + 1) * emb].astype(jnp.bfloat16)
        v_h = qkv[:, 2 * hk + h * emb:2 * hk + (h + 1) * emb].astype(jnp.bfloat16)

        # q @ k^T without an explicit transpose: contract on the last dims.
        s = lax.dot_general(q_h, k_h, (((1,), (1,)), ((), ())),
                            preferred_element_type=jnp.float32)        # (S, S) f32
        # Numerically-stable softmax along the last axis (== torch softmax dim=2).
        s = s - jnp.max(s, axis=-1, keepdims=True)
        p = jnp.exp(s)
        p = p * pl.reciprocal(jnp.sum(p, axis=-1, keepdims=True), approx=True)

        head_outs.append(
            jnp.dot(p.astype(jnp.bfloat16), v_h,
                    preferred_element_type=jnp.float32))               # (S, E) f32

    # Lane-dense (S, H*K) slab (last dim = 128 at the test shape) feeding the merge.
    attn = jnp.concatenate(head_outs, axis=-1).astype(jnp.bfloat16)

    out = jnp.dot(attn, wmerge_ref[...], preferred_element_type=jnp.float32)
    out = out + bmerge_ref[...]
    o_ref[0] = out.astype(o_ref.dtype)


# ---------------------------------------------------------------------------
# One-time parameter prep (torch nn.Linear weights are (out, in)):
#   - transpose to (in, out) once
#   - fold 1/sqrt(emb) into the Q weight
#   - concatenate Q/K/V into a single (k, 3*h*k) operand
#   - cast matmul weights to bf16
# ---------------------------------------------------------------------------
def prepare_params(params, heads, emb):
    scale = 1.0 / (emb ** 0.5)
    w_q = params["w_q"].T * scale                         # (k, h*k)
    w_qkv = jnp.concatenate([w_q, params["w_k"].T, params["w_v"].T], axis=1)
    return (w_qkv.astype(jnp.bfloat16),                   # (k, 3*h*k)
            params["w_merge"].T.astype(jnp.bfloat16),     # (h*k, k)
            params["b_merge"].reshape(1, emb).astype(jnp.float32))


@functools.partial(jax.jit, static_argnames=("heads",))
def multi_head_self_attention(x, w_qkv, w_merge, b_merge, *, heads):
    B, S, K = x.shape
    hk3 = w_qkv.shape[1]
    hk = w_merge.shape[0]
    return pl.pallas_call(
        functools.partial(_mhsa_kernel, heads=heads, emb=K),
        out_shape=jax.ShapeDtypeStruct((B, S, K), jnp.float32),
        grid=(B,),
        in_specs=[
            pl.BlockSpec((1, S, K), lambda b: (b, 0, 0)),     # x: one batch slice
            pl.BlockSpec((K, hk3), lambda b: (0, 0)),          # fused QKV weight
            pl.BlockSpec((hk, K), lambda b: (0, 0)),           # merge weight
            pl.BlockSpec((1, K), lambda b: (0, 0)),            # merge bias
        ],
        out_specs=pl.BlockSpec((1, S, K), lambda b: (b, 0, 0)),
        compiler_params=pltpu.CompilerParams(
            dimension_semantics=("parallel",)),                # shard batch across TCs
    )(x, w_qkv, w_merge, b_merge)


# ---------------------------------------------------------------------------
# Pure-jnp reference (matches the PyTorch module, uses the original params).
# ---------------------------------------------------------------------------
def reference(x, params, heads):
    B, S, k = x.shape
    q = (x @ params["w_q"].T).reshape(B, S, heads, k).transpose(0, 2, 1, 3)
    kk = (x @ params["w_k"].T).reshape(B, S, heads, k).transpose(0, 2, 1, 3)
    v = (x @ params["w_v"].T).reshape(B, S, heads, k).transpose(0, 2, 1, 3)
    q = q / k ** 0.25
    kk = kk / k ** 0.25
    s = jnp.einsum("bhqe,bhke->bhqk", q, kk)
    p = jax.nn.softmax(s, axis=-1)
    o = jnp.einsum("bhqk,bhke->bhqe", p, v)
    o = o.transpose(0, 2, 1, 3).reshape(B, S, heads * k)
    return o @ params["w_merge"].T + params["b_merge"]


if __name__ == "__main__":
    B, S, K, HEADS = 2, 8, 32, 4

    key = jax.random.PRNGKey(0)
    kx, k1, k2, k3, k4, k5 = jax.random.split(key, 6)

    x = jax.random.normal(kx, (B, S, K), dtype=jnp.float32)

    # Deterministic synthetic parameters (torch nn.Linear convention: (out, in)).
    params = {
        "w_q": 0.05 * jax.random.normal(k1, (HEADS * K, K), dtype=jnp.float32),
        "w_k": 0.05 * jax.random.normal(k2, (HEADS * K, K), dtype=jnp.float32),
        "w_v": 0.05 * jax.random.normal(k3, (HEADS * K, K), dtype=jnp.float32),
        "w_merge": 0.05 * jax.random.normal(k4, (K, HEADS * K), dtype=jnp.float32),
        "b_merge": 0.05 * jax.random.normal(k5, (K,), dtype=jnp.float32),
    }

    w_qkv, w_merge, b_merge = prepare_params(params, HEADS, K)

    out = multi_head_self_attention(x, w_qkv, w_merge, b_merge, heads=HEADS)
    out = jax.block_until_ready(out)

    ref = reference(x, params, HEADS)
    assert out.shape == (B, S, K)
    # Tolerance loosened vs. the pure-f32 version: bf16 MXU operands and the
    # approx EUP reciprocal introduce ~1e-3-level relative deviations.
    assert jnp.allclose(out, ref, atol=2e-2, rtol=2e-2), float(
        jnp.max(jnp.abs(out - ref)))

    print("KERNEL_OK")
</pallas_src>

<mosaic_0001>
module attributes {stable_mosaic.version = 11 : i64} {
  func.func @_mhsa_kernel(%arg0: i32, %arg1: memref<1x8x32xf32, #tpu.memory_space<vmem>>, %arg2: memref<32x384xbf16, #tpu.memory_space<vmem>>, %arg3: memref<128x32xbf16, #tpu.memory_space<vmem>>, %arg4: memref<1x32xf32, #tpu.memory_space<vmem>>, %arg5: memref<1x8x32xf32, #tpu.memory_space<vmem>>) attributes {dimension_semantics = [#tpu.dimension_semantics<parallel>], iteration_bounds = array<i64: 2>, scalar_prefetch = 0 : i64, scratch_operands = 0 : i64, tpu.core_type = #tpu.core_type<tc>, window_params = [{transform_indices = @transform_0, window_bounds = array<i64: 1, 8, 32>}, {pipeline_mode = #tpu.pipeline_mode<synchronous>, transform_indices = @transform_1, window_bounds = array<i64: 32, 384>}, {pipeline_mode = #tpu.pipeline_mode<synchronous>, transform_indices = @transform_2, window_bounds = array<i64: 128, 32>}, {pipeline_mode = #tpu.pipeline_mode<synchronous>, transform_indices = @transform_3, window_bounds = array<i64: 1, 32>}, {transform_indices = @transform_4, window_bounds = array<i64: 1, 8, 32>}]} {
    %c0 = arith.constant 0 : index
    %c0_0 = arith.constant 0 : index
    %c0_1 = arith.constant 0 : index
    %0 = vector.load %arg1[%c0, %c0_0, %c0_1] : memref<1x8x32xf32, #tpu.memory_space<vmem>>, vector<1x8x32xf32>
    %1 = vector.shape_cast %0 : vector<1x8x32xf32> to vector<8x32xf32>
    %2 = arith.truncf %1 : vector<8x32xf32> to vector<8x32xbf16>
    %c0_2 = arith.constant 0 : index
    %c0_3 = arith.constant 0 : index
    %3 = vector.load %arg2[%c0_2, %c0_3] : memref<32x384xbf16, #tpu.memory_space<vmem>>, vector<32x384xbf16>
    %cst = arith.constant dense<0.000000e+00> : vector<8x384xf32>
    %4 = tpu.matmul %2, %3, %cst {dimension_numbers = #tpu.dot_dimension_numbers<[1], [0], [0], [1], [0, 0, 1, 1], [], []>} : vector<8x32xbf16>, vector<32x384xbf16>, vector<8x384xf32> -> vector<8x384xf32>
    %5 = vector.extract_strided_slice %4 {offsets = [0, 0], sizes = [8, 32], strides = [1, 1]} : vector<8x384xf32> to vector<8x32xf32>
    %6 = arith.truncf %5 : vector<8x32xf32> to vector<8x32xbf16>
    %7 = vector.extract_strided_slice %4 {offsets = [0, 128], sizes = [8, 32], strides = [1, 1]} : vector<8x384xf32> to vector<8x32xf32>
    %8 = arith.truncf %7 : vector<8x32xf32> to vector<8x32xbf16>
    %9 = vector.extract_strided_slice %4 {offsets = [0, 256], sizes = [8, 32], strides = [1, 1]} : vector<8x384xf32> to vector<8x32xf32>
    %10 = arith.truncf %9 : vector<8x32xf32> to vector<8x32xbf16>
    %cst_4 = arith.constant dense<0.000000e+00> : vector<8x8xf32>
    %11 = tpu.matmul %6, %8, %cst_4 {dimension_numbers = #tpu.dot_dimension_numbers<[1], [1], [0], [0], [0, 0, 1, 0], [], []>} : vector<8x32xbf16>, vector<8x32xbf16>, vector<8x8xf32> -> vector<8x8xf32>
    %cst_5 = arith.constant dense<0xFF800000> : vector<8xf32>
    %12 = vector.multi_reduction <maximumf>, %11, %cst_5 [1] : vector<8x8xf32> to vector<8xf32>
    %13 = vector.shape_cast %12 : vector<8xf32> to vector<8x1xf32>
    %14 = vector.broadcast %13 : vector<8x1xf32> to vector<8x8xf32>
    %15 = arith.subf %11, %14 : vector<8x8xf32>
    %16 = math.exp %15 : vector<8x8xf32>
    %cst_6 = arith.constant dense<0.000000e+00> : vector<8xf32>
    %17 = vector.multi_reduction <add>, %16, %cst_6 [1] : vector<8x8xf32> to vector<8xf32>
    %18 = vector.shape_cast %17 : vector<8xf32> to vector<8x1xf32>
    %19 = tpu.reciprocal %18 {approx = true} : vector<8x1xf32> -> vector<8x1xf32>
    %20 = vector.broadcast %19 : vector<8x1xf32> to vector<8x8xf32>
    %21 = arith.mulf %16, %20 : vector<8x8xf32>
    %22 = arith.truncf %21 : vector<8x8xf32> to vector<8x8xbf16>
    %cst_7 = arith.constant dense<0.000000e+00> : vector<8x32xf32>
    %23 = tpu.matmul %22, %10, %cst_7 {dimension_numbers = #tpu.dot_dimension_numbers<[1], [0], [0], [1], [0, 0, 1, 1], [], []>} : vector<8x8xbf16>, vector<8x32xbf16>, vector<8x32xf32> -> vector<8x32xf32>
    %24 = vector.extract_strided_slice %4 {offsets = [0, 32], sizes = [8, 32], strides = [1, 1]} : vector<8x384xf32> to vector<8x32xf32>
    %25 = arith.truncf %24 : vector<8x32xf32> to vector<8x32xbf16>
    %26 = vector.extract_strided_slice %4 {offsets = [0, 160], sizes = [8, 32], strides = [1, 1]} : vector<8x384xf32> to vector<8x32xf32>
    %27 = arith.truncf %26 : vector<8x32xf32> to vector<8x32xbf16>
    %28 = vector.extract_strided_slice %4 {offsets = [0, 288], sizes = [8, 32], strides = [1, 1]} : vector<8x384xf32> to vector<8x32xf32>
    %29 = arith.truncf %28 : vector<8x32xf32> to vector<8x32xbf16>
    %cst_8 = arith.constant dense<0.000000e+00> : vector<8x8xf32>
    %30 = tpu.matmul %25, %27, %cst_8 {dimension_numbers = #tpu.dot_dimension_numbers<[1], [1], [0], [0], [0, 0, 1, 0], [], []>} : vector<8x32xbf16>, vector<8x32xbf16>, vector<8x8xf32> -> vector<8x8xf32>
    %cst_9 = arith.constant dense<0xFF800000> : vector<8xf32>
    %31 = vector.multi_reduction <maximumf>, %30, %cst_9 [1] : vector<8x8xf32> to vector<8xf32>
    %32 = vector.shape_cast %31 : vector<8xf32> to vector<8x1xf32>
    %33 = vector.broadcast %32 : vector<8x1xf32> to vector<8x8xf32>
    %34 = arith.subf %30, %33 : vector<8x8xf32>
    %35 = math.exp %34 : vector<8x8xf32>
    %cst_10 = arith.constant dense<0.000000e+00> : vector<8xf32>
    %36 = vector.multi_reduction <add>, %35, %cst_10 [1] : vector<8x8xf32> to vector<8xf32>
    %37 = vector.shape_cast %36 : vector<8xf32> to vector<8x1xf32>
    %38 = tpu.reciprocal %37 {approx = true} : vector<8x1xf32> -> vector<8x1xf32>
    %39 = vector.broadcast %38 : vector<8x1xf32> to vector<8x8xf32>
    %40 = arith.mulf %35, %39 : vector<8x8xf32>
    %41 = arith.truncf %40 : vector<8x8xf32> to vector<8x8xbf16>
    %cst_11 = arith.constant dense<0.000000e+00> : vector<8x32xf32>
    %42 = tpu.matmul %41, %29, %cst_11 {dimension_numbers = #tpu.dot_dimension_numbers<[1], [0], [0], [1], [0, 0, 1, 1], [], []>} : vector<8x8xbf16>, vector<8x32xbf16>, vector<8x32xf32> -> vector<8x32xf32>
    %43 = vector.extract_strided_slice %4 {offsets = [0, 64], sizes = [8, 32], strides = [1, 1]} : vector<8x384xf32> to vector<8x32xf32>
    %44 = arith.truncf %43 : vector<8x32xf32> to vector<8x32xbf16>
    %45 = vector.extract_strided_slice %4 {offsets = [0, 192], sizes = [8, 32], strides = [1, 1]} : vector<8x384xf32> to vector<8x32xf32>
    %46 = arith.truncf %45 : vector<8x32xf32> to vector<8x32xbf16>
    %47 = vector.extract_strided_slice %4 {offsets = [0, 320], sizes = [8, 32], strides = [1, 1]} : vector<8x384xf32> to vector<8x32xf32>
    %48 = arith.truncf %47 : vector<8x32xf32> to vector<8x32xbf16>
    %cst_12 = arith.constant dense<0.000000e+00> : vector<8x8xf32>
    %49 = tpu.matmul %44, %46, %cst_12 {dimension_numbers = #tpu.dot_dimension_numbers<[1], [1], [0], [0], [0, 0, 1, 0], [], []>} : vector<8x32xbf16>, vector<8x32xbf16>, vector<8x8xf32> -> vector<8x8xf32>
    %cst_13 = arith.constant dense<0xFF800000> : vector<8xf32>
    %50 = vector.multi_reduction <maximumf>, %49, %cst_13 [1] : vector<8x8xf32> to vector<8xf32>
    %51 = vector.shape_cast %50 : vector<8xf32> to vector<8x1xf32>
    %52 = vector.broadcast %51 : vector<8x1xf32> to vector<8x8xf32>
    %53 = arith.subf %49, %52 : vector<8x8xf32>
    %54 = math.exp %53 : vector<8x8xf32>
    %cst_14 = arith.constant dense<0.000000e+00> : vector<8xf32>
    %55 = vector.multi_reduction <add>, %54, %cst_14 [1] : vector<8x8xf32> to vector<8xf32>
    %56 = vector.shape_cast %55 : vector<8xf32> to vector<8x1xf32>
    %57 = tpu.reciprocal %56 {approx = true} : vector<8x1xf32> -> vector<8x1xf32>
    %58 = vector.broadcast %57 : vector<8x1xf32> to vector<8x8xf32>
    %59 = arith.mulf %54, %58 : vector<8x8xf32>
    %60 = arith.truncf %59 : vector<8x8xf32> to vector<8x8xbf16>
    %cst_15 = arith.constant dense<0.000000e+00> : vector<8x32xf32>
    %61 = tpu.matmul %60, %48, %cst_15 {dimension_numbers = #tpu.dot_dimension_numbers<[1], [0], [0], [1], [0, 0, 1, 1], [], []>} : vector<8x8xbf16>, vector<8x32xbf16>, vector<8x32xf32> -> vector<8x32xf32>
    %62 = vector.extract_strided_slice %4 {offsets = [0, 96], sizes = [8, 32], strides = [1, 1]} : vector<8x384xf32> to vector<8x32xf32>
    %63 = arith.truncf %62 : vector<8x32xf32> to vector<8x32xbf16>
    %64 = vector.extract_strided_slice %4 {offsets = [0, 224], sizes = [8, 32], strides = [1, 1]} : vector<8x384xf32> to vector<8x32xf32>
    %65 = arith.truncf %64 : vector<8x32xf32> to vector<8x32xbf16>
    %66 = vector.extract_strided_slice %4 {offsets = [0, 352], sizes = [8, 32], strides = [1, 1]} : vector<8x384xf32> to vector<8x32xf32>
    %67 = arith.truncf %66 : vector<8x32xf32> to vector<8x32xbf16>
    %cst_16 = arith.constant dense<0.000000e+00> : vector<8x8xf32>
    %68 = tpu.matmul %63, %65, %cst_16 {dimension_numbers = #tpu.dot_dimension_numbers<[1], [1], [0], [0], [0, 0, 1, 0], [], []>} : vector<8x32xbf16>, vector<8x32xbf16>, vector<8x8xf32> -> vector<8x8xf32>
    %cst_17 = arith.constant dense<0xFF800000> : vector<8xf32>
    %69 = vector.multi_reduction <maximumf>, %68, %cst_17 [1] : vector<8x8xf32> to vector<8xf32>
    %70 = vector.shape_cast %69 : vector<8xf32> to vector<8x1xf32>
    %71 = vector.broadcast %70 : vector<8x1xf32> to vector<8x8xf32>
    %72 = arith.subf %68, %71 : vector<8x8xf32>
    %73 = math.exp %72 : vector<8x8xf32>
    %cst_18 = arith.constant dense<0.000000e+00> : vector<8xf32>
    %74 = vector.multi_reduction <add>, %73, %cst_18 [1] : vector<8x8xf32> to vector<8xf32>
    %75 = vector.shape_cast %74 : vector<8xf32> to vector<8x1xf32>
    %76 = tpu.reciprocal %75 {approx = true} : vector<8x1xf32> -> vector<8x1xf32>
    %77 = vector.broadcast %76 : vector<8x1xf32> to vector<8x8xf32>
    %78 = arith.mulf %73, %77 : vector<8x8xf32>
    %79 = arith.truncf %78 : vector<8x8xf32> to vector<8x8xbf16>
    %cst_19 = arith.constant dense<0.000000e+00> : vector<8x32xf32>
    %80 = tpu.matmul %79, %67, %cst_19 {dimension_numbers = #tpu.dot_dimension_numbers<[1], [0], [0], [1], [0, 0, 1, 1], [], []>} : vector<8x8xbf16>, vector<8x32xbf16>, vector<8x32xf32> -> vector<8x32xf32>
    %81 = tpu.concatenate %23, %42, %61, %80 in 1 : vector<8x32xf32>, vector<8x32xf32>, vector<8x32xf32>, vector<8x32xf32> -> vector<8x128xf32>
    %82 = arith.truncf %81 : vector<8x128xf32> to vector<8x128xbf16>
    %c0_20 = arith.constant 0 : index
    %c0_21 = arith.constant 0 : index
    %83 = vector.load %arg3[%c0_20, %c0_21] : memref<128x32xbf16, #tpu.memory_space<vmem>>, vector<128x32xbf16>
    %cst_22 = arith.constant dense<0.000000e+00> : vector<8x32xf32>
    %84 = tpu.matmul %82, %83, %cst_22 {dimension_numbers = #tpu.dot_dimension_numbers<[1], [0], [0], [1], [0, 0, 1, 1], [], []>} : vector<8x128xbf16>, vector<128x32xbf16>, vector<8x32xf32> -> vector<8x32xf32>
    %c0_23 = arith.constant 0 : index
    %c0_24 = arith.constant 0 : index
    %85 = vector.load %arg4[%c0_23, %c0_24] : memref<1x32xf32, #tpu.memory_space<vmem>>, vector<1x32xf32>
    %86 = vector.broadcast %85 : vector<1x32xf32> to vector<8x32xf32>
    %87 = arith.addf %84, %86 : vector<8x32xf32>
    %c0_25 = arith.constant 0 : index
    %c0_26 = arith.constant 0 : index
    %c0_27 = arith.constant 0 : index
    %88 = vector.load %arg5[%c0_25, %c0_26, %c0_27] : memref<1x8x32xf32, #tpu.memory_space<vmem>>, vector<1x8x32xf32>
    %89 = vector.shape_cast %88 : vector<1x8x32xf32> to vector<8x32xf32>
    %90 = vector.shape_cast %87 : vector<8x32xf32> to vector<1x8x32xf32>
    tpu.vector_store %arg5[%c0_25, %c0_26, %c0_27], %90 {strides = array<i32>} : memref<1x8x32xf32, #tpu.memory_space<vmem>>, vector<1x8x32xf32>,
    return
  }
  func.func @transform_0(%arg0: i32) -> (i32, i32, i32) {
    %c0_i32 = arith.constant 0 : i32
    %c0_i32_0 = arith.constant 0 : i32
    %c0_i32_1 = arith.constant 0 : i32
    return %arg0, %c0_i32, %c0_i32_0 : i32, i32, i32
  }
  func.func @transform_1(%arg0: i32) -> (i32, i32) {
    %c0_i32 = arith.constant 0 : i32
    %c0_i32_0 = arith.constant 0 : i32
    %c0_i32_1 = arith.constant 0 : i32
    return %c0_i32, %c0_i32_0 : i32, i32
  }
  func.func @transform_2(%arg0: i32) -> (i32, i32) {
    %c0_i32 = arith.constant 0 : i32
    %c0_i32_0 = arith.constant 0 : i32
    %c0_i32_1 = arith.constant 0 : i32
    return %c0_i32, %c0_i32_0 : i32, i32
  }
  func.func @transform_3(%arg0: i32) -> (i32, i32) {
    %c0_i32 = arith.constant 0 : i32
    %c0_i32_0 = arith.constant 0 : i32
    %c0_i32_1 = arith.constant 0 : i32
    return %c0_i32, %c0_i32_0 : i32, i32
  }
  func.func @transform_4(%arg0: i32) -> (i32, i32, i32) {
    %c0_i32 = arith.constant 0 : i32
    %c0_i32_0 = arith.constant 0 : i32
    %c0_i32_1 = arith.constant 0 : i32
    return %arg0, %c0_i32, %c0_i32_0 : i32, i32, i32
  }
}

</mosaic_0001>

<bundles_post_ra>
// kernel: multi_head_self_attention.1
= control target key start
LH: loop header
LB: loop body
LE: loop exit
PB: predicated region body
PF: predicated region fallthrough
CT: control target
= control target key end

     0   :  { %9 = vsyncpa [#allocation3], 0  ;;  %s1504_s0 = inlined_call_operand.vmem [shape: f32[2,8,32], index: 0, kind: input, shape index: {}]   ;;  %s1505_s1 = inlined_call_operand.vmem [shape: bf16[32,384], index: 1, kind: input, shape index: {}]   ;;  %s1506_s2 = inlined_call_operand.vmem [shape: bf16[128,32], index: 2, kind: input, shape index: {}]   ;;  %s1507_s3 = inlined_call_operand.vmem [shape: f32[1,32], index: 3, kind: input, shape index: {}]   ;;  %s1508_s4 = inlined_call_operand.hbm [shape: f32[2,8,32], index: 4, kind: output, shape index: {}]  }
   0x1   :  { %11 = vsyncpa [#allocation3 + $0x1], 0  ;;  %s1276_s15 = smov 0   ;;  %s1278_s16 = smov 0  }
   0x2   :  { %s1280_s17 = smov 0   ;;  %s1282_s18 = smov 0  }
   0x3 LB: > { %s1297_s19 = sadd.s32 4294967295, %s1242_s18   ;;  %s966_s20 = sadd.s32 4294967294, %s1242_s18   ;;  %s1242_s18 = sphi %s1282_s18, %s1514_s18   ;;  %s1238_s17 = sphi %s1280_s17, %s1513_s17   ;;  %s1234_s16 = sphi %s1278_s16, %s1512_s16   ;;  %s1230_s15 = sphi %s1276_s15, %s1511_s15  }
   0x4   : > { %s1301_s21 = sadd.s32 1, %s1242_s18   ;;  %s113_s22 = sadd.s32 1, %s1238_s17 }
   0x5   : > { %s110_s23 = ssub.s32 %s1242_s18, %s1301_s21  ;;  %p123_p0 = scmp.ne.s32.totalorder %s1238_s17, %s1234_s16 }
   0x6   : > { %p111_p1 = scmp.eq.s32.totalorder %s110_s23, 0  ;;  %p124_p2 = scmp.eq.s32.totalorder %s1297_s19, 1 }
   0x7   : > { %p129_p3 = scmp.ne.s32.totalorder %s1234_s16, %s1230_s15  ;;  %p130_p4 = scmp.eq.s32.totalorder %s966_s20, 1 }
   0x8   : > { %s1312_s24 = scalar_select %p111_p1, %s1238_s17, %s113_s22  }
   0x9   : > { %p1314_p5 = por %p124_p2, %p123_p0  ;;  %p1318_p6 = por %p130_p4, %p129_p3 }
   0xa   : > { %p969_p7 = scmp.ge.s32.totalorder %s1242_s18, 1  ;;  %p164_p8 = scmp.lt.s32.totalorder %s1242_s18, 3 }
   0xc   : > { %p165_p9 = pnand %p969_p7, %p164_p8 }
   0xd   : > { %p189_p10 = scmp.lt.s32.totalorder (!%p165_p9), %s1297_s19, 1  ;;  %s1247_s27 = smov (!%p165_p9), 64  }
   0xe   : > { %168 = sbr.rel (%p165_p9) target bundleno = 1391 (0x56f), region = 36  ;;  %s1248_s28 = smov (!%p165_p9), 96  }
   0xf   : > { %s1249_s29 = smov (!%p165_p9), 32   ;;  %s1250_s14 = smov (!%p165_p9), [#allocation2]  }
  0x10   : > { %s1186_s20 = sshll.u32 (!%p165_p9), %s1250_s14, 4  ;;  %s1187_s20 = int_to_ptr.vmem [resolvable:$false] %s1186_s20 }
  0x11   : > { %s1188_s22 = scalar_lea.vmem (!%p165_p9), %s1187_s20, 256 }
  0x13   : > { %v1150_v0 = vld [vmem:[%s1505_s1 + $0x1c] ss:$12 sps:$4 sm:$0xff]   ;;  %v1152_v1 = vld [vmem:[%s1505_s1 + $0x18] ss:$12 sps:$4 sm:$0xff]   ;;  %v1244_v2 = vmov 0   ;;  %s190_s7 = scalar_select %p189_p10, %s1297_s19, 1 }
  0x14   : > { %272 = vmatprep.mubr.bf16.mxu1 %v1244_v2  ;;  %252 = vmatprep.subr.bf16.mxu1 %v1150_v0  ;;  %v1153_v3 = vld [vmem:[%s1505_s1 + $0x4] ss:$12 sps:$4 sm:$0xff]   ;;  %v1245_v4 = vmov 0.0   ;;  %v1155_v5 = vld [vmem:[%s1505_s1] ss:$12 sps:$4 sm:$0xff]   ;;  %vm236_vm0 = vcmask 261120  }
  0x15   : > { %1049 = vmatprep.subr.bf16.mxu0 %v1245_v4  ;;  %253 = vmatpush1.bf16.msra.mxu1 %v1152_v1  ;;  %s971_s10 = sshll.u32 %s190_s7, 3  ;;  %v1156_v6 = vld [vmem:[%s1505_s1 + $0x20] ss:$12 sps:$4 sm:$0xff]   ;;  %v1157_v9 = vld [vmem:[%s1505_s1 + $0x8] ss:$12 sps:$4 sm:$0xff]   ;;  %vm1246_vm1 = vmmov 0  }
  0x16   : > { %254 = vmatprep.subr.bf16.mxu1 %v1153_v3  ;;  %s192_s13 = scalar_lea.vmem %s1504_s0, %s971_s10  ;;  %1051 = vmatprep.mubr.msk.bf16.mxu0 %vm1246_vm1, %v1245_v4  ;;  %vm386_vm2 = vcmask 1043456   ;;  %vm370_vm3 = vcmask 64512   ;;  %vm776_vm4 = vcmask 523264   ;;  %vm778_vm5 = vcmask 785408   ;;  %s998_s7 = sshll.u32 %s1297_s19, 7 }
  0x17   : > { %v194_v7 = vld [vmem:[%s192_s13] sm:$0xff]  ;;  %s1462_s12 = scalar_lea.hbm %s1508_s4, %s998_s7 }
  0x18   : > { %v195_v8 = vpack.c.bf16 %v194_v7, %v194_v7 }
  0x19   : > { %255 = vmatpush1.bf16.msra.mxu1 %v1155_v5 }
  0x1a   : > { %1029 = vmatprep.subr.bf16.mxu1 %v1245_v4 }
  0x1c   : > { %978 = vmatmul.mubr.msk.bf16.vlgmr.msra.gmra.mxu1 %vm236_vm0, %v195_v8 }
  0x1d   : > { %1030 = vmatpush3.bf16.msra.mxu1 %v1156_v6  ;;  %1033 = vmatprep.mubr.msk.bf16.mxu1 %vm1246_vm1, %v1245_v4 }
  0x1e   : > { %1031 = vmatprep.subr.bf16.mxu1 %v1245_v4 }
  0x21   : > { %1032 = vmatpush3.bf16.msra.mxu1 %v1157_v9 }
  0x22   : > { %1037 = vmatprep.subr.bf16.mxu1 %v1245_v4 }
  0x24   : > { %1034 = vmatmul.mubr.msk.bf16.vlgmr.msra.gmra.mxu1 %vm236_vm0, %v195_v8 }
  0x25   : > { %1039 = vmatprep.mubr.msk.bf16.mxu1 %vm1246_vm1, %v1245_v4 }
  0xdc   : > { %v274_v10 = vpop.f32.mrf.mxu1 }
  0xdd   : > { %v321_v16 = vpack.c.bf16 %v274_v10, %v274_v10 }
  0xde   : > { %v276_v11 = vpop.f32.mrf.mxu1 }
  0xdf   : > { %v322_v12 = vpack.c.bf16 %v276_v11, %v276_v11 }
  0xe0   : > { %v278_v13 = vpop.f32.mrf.mxu1 }
  0xe1   : > { %545 = vrot.lane.b32.xlu1 %v322_v12, %s1247_s27  ;;  %434 = vrot.lane.b32.xlu0 %v322_v12, %s1248_s28  ;;  %v328_v14 = vsel %vm236_vm0, %v322_v12, 0 }
  0xe2   : > { %v279_v15 = vpop.f32.mrf.mxu1  ;;  %1038 = vmatpush3.bf16.xpose.msra.mxu1 %v328_v14 }
  0xe3   : > { %1043 = vmatprep.subr.bf16.mxu1 %v1245_v4 }
  0xe4   : > { %v315_v17 = vpop.f32.mrf.mxu1 }
  0xe5   : > { %543 = vrot.lane.b32.xlu1 %v321_v16, %s1247_s27  ;;  %431 = vrot.lane.b32.xlu0 %v321_v16, %s1248_s28  ;;  %v1370_v21 = vpack.c.bf16 %v315_v17, %v315_v17 }
  0xe6   : > { %v1035_v18 = vpop.f32.mrf.mxu1 }
  0xe7   : > { %v388_v22 = vsel %vm386_vm2, %v1370_v21, 0 }
  0xe8   : > { %v318_v19 = vpop.f32.mrf.mxu1 }
  0xe9   : > { %653 = vrot.lane.b32.xlu1 %v321_v16, %s1249_s29  ;;  %655 = vrot.lane.b32.xlu0 %v322_v12, %s1249_s29 }
  0xea   : > { %1040 = vmatmul.mubr.msk.bf16.vlgmr.msra.gmra.mxu1 %vm236_vm0, %v321_v16  ;;  %v1036_v20 = vpop.f32.mrf.mxu1 }
  0xeb   : > { %1045 = vmatprep.mubr.msk.bf16.mxu1 %vm1246_vm1, %v1245_v4  ;;  %1044 = vmatpush3.bf16.msra.mxu1 %v388_v22 }
  0xec   : > { %1055 = vmatprep.subr.bf16.mxu1 %v1245_v4 }
 0x153   : > { %v435_v23 = vpop.permute.xlu0 %434  ;;  %v546_v25 = vpop.permute.xlu1 %545 }
 0x154   : > { %v440_v24 = vsel %vm236_vm0, %v435_v23, 0  ;;  %v551_v27 = vsel %vm236_vm0, %v546_v25, 0 }
 0x155   : > { %1050 = vmatpush3.bf16.xpose.msra.mxu0 %v440_v24 }
 0x156   : > { %1061 = vmatprep.subr.bf16.mxu0 %v1245_v4 }
 0x157   : > { %v432_v26 = vpop.permute.xlu0 %431  ;;  %v544_v29 = vpop.permute.xlu1 %543 }
 0x15b   : > { %v656_v28 = vpop.permute.xlu0 %655  ;;  %v654_v31 = vpop.permute.xlu1 %653 }
 0x15c   : > { %1052 = vmatmul.mubr.msk.bf16.vlgmr.msra.gmra.mxu0 %vm236_vm0, %v432_v26  ;;  %v661_v30 = vsel %vm236_vm0, %v656_v28, 0 }
 0x15d   : > { %1062 = vmatpush3.bf16.xpose.msra.mxu0 %v551_v27  ;;  %1063 = vmatprep.mubr.msk.bf16.mxu0 %vm1246_vm1, %v1245_v4 }
 0x15e   : > { %1073 = vmatprep.subr.bf16.mxu0 %v1245_v4 }
 0x164   : > { %1064 = vmatmul.mubr.msk.bf16.vlgmr.msra.gmra.mxu0 %vm236_vm0, %v544_v29 }
 0x165   : > { %1074 = vmatpush3.bf16.xpose.msra.mxu0 %v661_v30  ;;  %1075 = vmatprep.mubr.msk.bf16.mxu0 %vm1246_vm1, %v1245_v4 }
 0x166   : > { %1085 = vmatprep.subr.bf16.mxu0 %v1245_v4 }
 0x16c   : > { %1076 = vmatmul.mubr.msk.bf16.vlgmr.msra.gmra.mxu0 %vm236_vm0, %v654_v31 }
 0x16d   : > { %1101 = vmatprep.mubr.msk.bf16.mxu0 %vm1246_vm1, %v1245_v4 }
 0x1aa   : > { %v364_v32 = vpop.f32.mrf.mxu1 }
 0x1ab   : > { %v371_v33 = vsel %vm370_vm3, %v364_v32, -inf }
 0x1ac   : > { %372 = vmax.xlane.f32.xlu0 %v371_v33  ;;  %v1041_v34 = vpop.f32.mrf.mxu1 }
 0x1ae   : > { %v367_v35 = vpop.f32.mrf.mxu1 }
 0x1af   : > { %v1158_v35 = vld [vmem:[%s1506_s2 + $0x38] sm:$0xff]  }
 0x1b0   : > { %v1042_v36 = vpop.f32.mrf.mxu1  ;;  %1086 = vmatpush3.bf16.msra.mxu0 %v1158_v35 }
 0x1b1   : > { %v1159_v36 = vld [vmem:[%s1506_s2 + $0x30] sm:$0xff]   ;;  %1087 = vmatprep.subr.bf16.mxu0 %v1245_v4 }
 0x1b4   : > { %1088 = vmatpush3.bf16.msra.mxu0 %v1159_v36 }
 0x1b5   : > { %1089 = vmatprep.subr.bf16.mxu0 %v1245_v4 }
 0x21c   : > { %v476_v37 = vpop.f32.mrf.mxu0 }
 0x21d   : > { %v482_v38 = vsel %vm370_vm3, %v476_v37, -inf }
 0x21e   : > { %483 = vmax.xlane.f32.xlu1 %v482_v38  ;;  %v1053_v39 = vpop.f32.mrf.mxu0  ;;  %v1161_v38 = vld [vmem:[%s1506_s2 + $0x20] sm:$0xff]  }
 0x21f   : > { %v1162_v39 = vld [vmem:[%s1506_s2 + $0x18] sm:$0xff]  }
 0x220   : > { %v479_v40 = vpop.f32.mrf.mxu0 }
 0x221   : > { %v1163_v40 = vld [vmem:[%s1506_s2 + $0x10] sm:$0xff]  }
 0x222   : > { %v1054_v41 = vpop.f32.mrf.mxu0 }
 0x223   : > { %v1164_v41 = vld [vmem:[%s1506_s2 + $0x8] sm:$0xff]  }
 0x224   : > { %v587_v42 = vpop.f32.mrf.mxu0 }
 0x225   : > { %v593_v43 = vsel %vm370_vm3, %v587_v42, -inf }
 0x226   : > { %v1065_v44 = vpop.f32.mrf.mxu0  ;;  %594 = vmax.xlane.f32.xlu0 %v593_v43 }
 0x228   : > { %v590_v45 = vpop.f32.mrf.mxu0 }
 0x229   : > { %v1165_v45 = vld [vmem:[%s1506_s2] sm:$0xff]  }
 0x22a   : > { %v1066_v46 = vpop.f32.mrf.mxu0 }
 0x22c   : > { %v697_v47 = vpop.f32.mrf.mxu0 }
 0x22d   : > { %v703_v48 = vsel %vm370_vm3, %v697_v47, -inf }
 0x22e   : > { %v1077_v49 = vpop.f32.mrf.mxu0  ;;  %704 = vmax.xlane.f32.xlu0 %v703_v48 }
 0x230   : > { %v700_v50 = vpop.f32.mrf.mxu0 }
 0x232   : > { %v1078_v51 = vpop.f32.mrf.mxu0 }
 0x235   : > { %v373_v52 = vpop.xlane.xlu0 %372 }
 0x236   : > { %v374_v53 = vsub.f32 %v364_v32, %v373_v52 }
 0x238   : > { %v375_v54 = vmul.f32 1.442695, %v374_v53 }
 0x23a   : > { %1166 = vpow2.f32 %v375_v54 }
 0x247   : > { %v1167_v55 = vpop.eup %1166 }
 0x248   : > { %v377_v56 = vsel %vm370_vm3, %v1167_v55, 0.0 }
 0x249   : > { %378 = vadd.xlane.f32.xlu1 %v377_v56 }
 0x25a   : > { %495 = vrot.lane.b32.xlu1 %v1370_v21, %s1248_s28 }
 0x2a7   : > { %v484_v57 = vpop.xlane.xlu1 %483 }
 0x2a8   : > { %v485_v58 = vsub.f32 %v476_v37, %v484_v57  ;;  %v1160_v37 = vld [vmem:[%s1506_s2 + $0x28] sm:$0xff]  }
 0x2a9   : > { %1090 = vmatpush3.bf16.msra.mxu0 %v1160_v37 }
 0x2aa   : > { %v486_v59 = vmul.f32 1.442695, %v485_v58  ;;  %1091 = vmatprep.subr.bf16.mxu0 %v1245_v4 }
 0x2ac   : > { %1168 = vpow2.f32 %v486_v59 }
 0x2ad   : > { %1092 = vmatpush3.bf16.msra.mxu0 %v1161_v38 }
 0x2ae   : > { %1093 = vmatprep.subr.bf16.mxu0 %v1245_v4 }
 0x2af   : > { %v595_v60 = vpop.xlane.xlu0 %594 }
 0x2b0   : > { %v596_v61 = vsub.f32 %v587_v42, %v595_v60 }
 0x2b1   : > { %1094 = vmatpush3.bf16.msra.mxu0 %v1162_v39 }
 0x2b2   : > { %v597_v62 = vmul.f32 1.442695, %v596_v61  ;;  %1095 = vmatprep.subr.bf16.mxu0 %v1245_v4  ;;  %v988_v61 = vld [vmem:[%s1507_s3] ss:$0 sm:$0xff] }
 0x2b4   : > { %1170 = vpow2.f32 %v597_v62 }
 0x2b5   : > { %1096 = vmatpush3.bf16.msra.mxu0 %v1163_v40 }
 0x2b6   : > { %1097 = vmatprep.subr.bf16.mxu0 %v1245_v4 }
 0x2b7   : > { %v705_v63 = vpop.xlane.xlu0 %704 }
 0x2b8   : > { %v706_v0 = vsub.f32 %v697_v47, %v705_v63 }
 0x2b9   : > { %v1169_v1 = vpop.eup %1168  ;;  %1098 = vmatpush3.bf16.msra.mxu0 %v1164_v41 }
 0x2ba   : > { %v707_v2 = vmul.f32 1.442695, %v706_v0  ;;  %v488_v3 = vsel %vm370_vm3, %v1169_v1, 0.0  ;;  %1099 = vmatprep.subr.bf16.mxu0 %v1245_v4 }
 0x2bb   : > { %489 = vadd.xlane.f32.xlu0 %v488_v3 }
 0x2bc   : > { %1172 = vpow2.f32 %v707_v2 }
 0x2bd   : > { %1100 = vmatpush3.bf16.msra.mxu0 %v1165_v45 }
 0x2c1   : > { %v1171_v5 = vpop.eup %1170 }
 0x2c2   : > { %v599_v6 = vsel %vm370_vm3, %v1171_v5, 0.0 }
 0x2c3   : > { %600 = vadd.xlane.f32.xlu1 %v599_v6 }
 0x2c9   : > { %v1173_v7 = vpop.eup %1172 }
 0x2ca   : > { %v709_v8 = vsel %vm370_vm3, %v1173_v7, 0.0 }
 0x2cb   : > { %710 = vadd.xlane.f32.xlu0 %v709_v8 }
 0x2d2   : > { %v379_v9 = vpop.xlane.xlu1 %378 }
 0x2d3   : > { %1174 = vrcp.f32 %v379_v9 }
 0x2d4   : > { %715 = vrot.lane.b32.xlu1 %v1370_v21, %s1249_s29 }
 0x2d6   : > { %v496_v12 = vpop.permute.xlu1 %495 }
 0x2d7   : > { %v501_v14 = vsel %vm386_vm2, %v496_v12, 0 }
 0x2e0   : > { %v1175_v10 = vpop.eup %1174 }
 0x2e1   : > { %605 = vrot.lane.b32.xlu0 %v1370_v21, %s1247_s27  ;;  %v381_v11 = vmul.f32 %v1175_v10, %v1167_v55 }
 0x2e3   : > { %v382_v13 = vpack.c.bf16 %v381_v11, %v381_v11 }
 0x2e5   : > { %1046 = vmatmul.mubr.msk.bf16.vlgmr.msra.gmra.mxu1 %vm370_vm3, %v382_v13 }
 0x2e6   : > { %1056 = vmatpush3.bf16.msra.mxu1 %v501_v14  ;;  %1057 = vmatprep.mubr.msk.bf16.mxu1 %vm1246_vm1, %v1245_v4 }
 0x2e7   : > { %1067 = vmatprep.subr.bf16.mxu1 %v1245_v4 }
 0x344   : > { %v490_v15 = vpop.xlane.xlu0 %489 }
 0x345   : > { %1176 = vrcp.f32 %v490_v15 }
 0x34c   : > { %v601_v16 = vpop.xlane.xlu1 %600 }
 0x34d   : > { %1178 = vrcp.f32 %v601_v16 }
 0x350   : > { %v716_v25 = vpop.permute.xlu1 %715 }
 0x351   : > { %v721_v27 = vsel %vm386_vm2, %v716_v25, 0 }
 0x352   : > { %v1177_v17 = vpop.eup %1176 }
 0x353   : > { %v492_v18 = vmul.f32 %v1177_v17, %v1169_v1 }
 0x354   : > { %v711_v19 = vpop.xlane.xlu0 %710 }
 0x355   : > { %1180 = vrcp.f32 %v711_v19  ;;  %v493_v20 = vpack.c.bf16 %v492_v18, %v492_v18 }
 0x357   : > { %1058 = vmatmul.mubr.msk.bf16.vlgmr.msra.gmra.mxu1 %vm370_vm3, %v493_v20 }
 0x358   : > { %v606_v21 = vpop.permute.xlu0 %605  ;;  %1069 = vmatprep.mubr.msk.bf16.mxu1 %vm1246_vm1, %v1245_v4 }
 0x359   : > { %v611_v22 = vsel %vm386_vm2, %v606_v21, 0 }
 0x35a   : > { %v1179_v23 = vpop.eup %1178  ;;  %1068 = vmatpush3.bf16.msra.mxu1 %v611_v22 }
 0x35b   : > { %1079 = vmatprep.subr.bf16.mxu1 %v1245_v4  ;;  %v603_v24 = vmul.f32 %v1179_v23, %v1171_v5 }
 0x35d   : > { %v604_v26 = vpack.c.bf16 %v603_v24, %v603_v24 }
 0x35f   : > { %1070 = vmatmul.mubr.msk.bf16.vlgmr.msra.gmra.mxu1 %vm370_vm3, %v604_v26 }
 0x360   : > { %1080 = vmatpush3.bf16.msra.mxu1 %v721_v27  ;;  %1081 = vmatprep.mubr.msk.bf16.mxu1 %vm1246_vm1, %v1245_v4 }
 0x362   : > { %v1181_v28 = vpop.eup %1180 }
 0x363   : > { %v713_v29 = vmul.f32 %v1181_v28, %v1173_v7 }
 0x365   : > { %v714_v30 = vpack.c.bf16 %v713_v29, %v713_v29 }
 0x367   : > { %1082 = vmatmul.mubr.msk.bf16.vlgmr.msra.gmra.mxu1 %vm370_vm3, %v714_v30 }
 0x3a5   : > { %v424_v31 = vpop.f32.mrf.mxu1 }
 0x3a7   : > { %v1047_v32 = vpop.f32.mrf.mxu1 }
 0x3a9   : > { %v427_v33 = vpop.f32.mrf.mxu1 }
 0x3ab   : > { %v1048_v34 = vpop.f32.mrf.mxu1 }
 0x417   : > { %v537_v42 = vpop.f32.mrf.mxu1 }
 0x418   : > { %764 = vrot.lane.b32.xlu1 %v537_v42, %s1249_s29 }
 0x419   : > { %v1059_v43 = vpop.f32.mrf.mxu1 }
 0x41b   : > { %v540_v44 = vpop.f32.mrf.mxu1 }
 0x41d   : > { %v1060_v46 = vpop.f32.mrf.mxu1 }
 0x41f   : > { %v647_v47 = vpop.f32.mrf.mxu1 }
 0x420   : > { %768 = vrot.lane.b32.xlu0 %v647_v47, %s1247_s27  ;;  %s186_s27 = sand.u32 1, %s1234_s16  }
 0x421   : > { %v1071_v48 = vpop.f32.mrf.mxu1  ;;  %s970_s29 = sshll.u32 %s186_s27, 3  ;;  %s894_s13 = scalar_lea.sflag [#allocation3], %s186_s27 }
 0x422   : > { %s188_s8 = scalar_lea.vmem [#allocation2], %s970_s29 }
 0x423   : > { %v650_v49 = vpop.f32.mrf.mxu1  ;;  %s907_s9 = sshll.u32 %s188_s8, 4  ;;  %s1464_s9 = int_to_ptr.vmem [resolvable:$true] %s907_s9 }
 0x424   : > { %s1182_s19 = scalar_lea.vmem %s1464_s9, 128  ;;  %p1189_p0 = scmp.lt.s32.totalorder %s1464_s9, %s1187_s20 }
 0x425   : > { %v1072_v50 = vpop.f32.mrf.mxu1  ;;  %p1183_p11 = scmp.ne.s32.totalorder %s1464_s9, %s1182_s19  ;;  %p1190_p1 = scmp.lt.s32.totalorder %s1188_s22, %s1182_s19 }
 0x427   : > { %v757_v51 = vpop.f32.mrf.mxu1  ;;  %p1184_p12 = pnand %p1183_p11, %p1314_p5  ;;  %p1191_p2 = por %p1190_p1, %p1189_p0 }
 0x428   : > { %772 = vrot.lane.b32.xlu1 %v757_v51, %s1248_s28 }
 0x429   : > { %v1083_v52 = vpop.f32.mrf.mxu1  ;;  %p1185_p13 = pneg %p1184_p12 }
 0x42b   : > { %v760_v4 = vpop.f32.mrf.mxu1  ;;  %p1192_p3 = pnand %p1191_p2, %p1185_p13 }
 0x42d   : > { %v1084_v53 = vpop.f32.mrf.mxu1 }
 0x48a   : > { %v765_v54 = vpop.permute.xlu1 %764 }
 0x48b   : > { %v775_v56 = vsel %vm236_vm0, %v424_v31, %v765_v54 }
 0x492   : > { %v769_v55 = vpop.permute.xlu0 %768 }
 0x493   : > { %v777_v57 = vsel %vm776_vm4, %v775_v56, %v769_v55 }
 0x49a   : > { %v773_v58 = vpop.permute.xlu1 %772 }
 0x49b   : > { %v779_v59 = vsel %vm778_vm5, %v777_v57, %v773_v58 }
 0x49c   : > { %v780_v60 = vpack.c.bf16 %v779_v59, %v779_v59 }
 0x49e   : > { %1102 = vmatmul.mubr.bf16.vlgmr.msra.gmra.mxu0 %v780_v60 }
 0x55e   : > { %v886_v62 = vpop.f32.mrf.mxu0 }
 0x55f   : > { %v887_v63 = vadd.f32 %v988_v61, %v886_v62 }
 0x560   : > { %v1103_v0 = vpop.f32.mrf.mxu0 }
 0x561   : > { %892 = vst.msk [vmem:[%s188_s8] sm:$0xff] %vm236_vm0, %v887_v63 }
 0x562   : > { %v889_v1 = vpop.f32.mrf.mxu0 }
 0x563   : > { %1195 = shalt.err (!%p1192_p3)
}
 0x564   : > { %s1196_s23 = scalar_lea.hbm %s1462_s12, 128  ;;  %s1200_s27 = scalar_lea.hbm %s1508_s4, 256 }
 0x565   : > { %p1197_p4 = scmp.ne.s32.totalorder %s1462_s12, %s1196_s23  ;;  %p1201_p9 = scmp.lt.s32.totalorder %s1462_s12, %s1508_s4 }
 0x566   : > { %p1202_p10 = scmp.lt.s32.totalorder %s1200_s27, %s1196_s23 }
 0x567   : > { %p1198_p7 = pnand %p1197_p4, %p1314_p5 }
 0x568   : > { %p1203_p11 = por %p1202_p10, %p1201_p9 }
 0x569   : > { %p1199_p8 = pneg %p1198_p7 }
 0x56b   : > { %p1204_p12 = pnand %p1203_p11, %p1199_p8 }
 0x56d   : > { %1207 = shalt.err (!%p1204_p12)
}
 0x56e   : > { %1105 = dma.vmem_to_hbm [thread:$0]  (%p1314_p5), %s1464_s9, 128, %s1462_s12, %s894_s13   ;;  %v1104_v2 = vpop.f32.mrf.mxu0 }
 0x56f PF: > { %p1111_p13 = scmp.ge.s32.totalorder %s1242_s18, 2  ;;  %s919_s28 = sand.u32 1, %s1230_s15  }
 0x570   : > { %s920_s7 = scalar_lea.sflag [#allocation3], %s919_s28 }
 0x571   : > { %p1108_p0 = pnand %p1111_p13, %p1318_p6 }
 0x573   : > { %p1109_p1 = pneg %p1108_p0 }
 0x575   : > { %1225 = dma.done.wait (%p1109_p1), %s920_s7, 128  }
 0x576   : > { %1227 = vsyncadd (%p1109_p1), %s920_s7, 4294967168  ;;  %p14_p2 = scmp.ge.s32.totalorder %s1301_s21, 4   ;;  %s1511_s15 = smov %s1234_s16 }
 0x577   : > { %s1512_s16 = smov %s1238_s17  ;;  %s1513_s17 = smov %s1312_s24 }
 0x578   : > { %s1514_s18 = smov %s1301_s21  ;;  %16 = sbr.rel (!%p14_p2) target bundleno = 3 (0x3), region = 71 }
 0x57d   :  { %925 = vsyncpa [#allocation3], 1 }
 0x57e   :  { %927 = vsyncpa [#allocation3 + $0x1], 1 }

</bundles_post_ra>
